<compile_context>
chip_gen: v7x
topology: tpu7x:2x2x1
jax: 0.10.0
libtpu: 0.0.40
codegen_flags: <defaults>
</compile_context>

<pallas_src>
import functools
import math

import jax
import jax.numpy as jnp
from jax import lax
from jax.experimental import pallas as pl
from jax.experimental.pallas import tpu as pltpu


def _mha_kernel(x_ref, wqkv_ref, wp_ref, bp_ref, o_ref, *, num_heads, head_size):
    # x_ref: (Bb, T, E)   wqkv_ref: (E, 3E) bf16   wp_ref: (H, hs, E) bf16
    # bp_ref: (1, E) f32  o_ref: (Bb, T, E)
    Bb, T, E = x_ref.shape
    H, hs = num_heads, head_size

    # bf16 MXU operands, f32 accumulation.
    x = x_ref[...].astype(jnp.bfloat16)                            # (Bb, T, E)

    # Fused Q/K/V projection: one lane-dense matmul on the MXU.
    # (1/sqrt(hs) already folded into the Wq columns by the wrapper.)
    qkv = jnp.einsum("bte,ef->btf", x, wqkv_ref[...],
                     preferred_element_type=jnp.float32)           # (Bb, T, 3E) f32

    # Causal mask, shared across heads and batch rows.
    row = lax.broadcasted_iota(jnp.int32, (T, T), 0)
    col = lax.broadcasted_iota(jnp.int32, (T, T), 1)
    causal = (col <= row)[None, :, :]                              # (1, T, T)
    neg_big = jnp.float32(-1e30)                                   # finite: no NaN risk

    acc = jnp.zeros((Bb, T, E), jnp.float32)

    # Static head loop (H is small here).  The head concat is folded into the
    # output projection by accumulating head_out @ W_proj[h*hs:(h+1)*hs, :].
    # TODO(synk): for large H / long T, move heads onto a grid axis and use
    # flash-style (tq, tk) online-softmax tiling instead of (T, T) scores.
    for h in range(H):
        lo = h * hs
        q = qkv[:, :, lo:lo + hs].astype(jnp.bfloat16)             # (Bb, T, hs)
        k = qkv[:, :, E + lo:E + lo + hs].astype(jnp.bfloat16)
        v = qkv[:, :, 2 * E + lo:2 * E + lo + hs].astype(jnp.bfloat16)

        # Contract the last dims directly: no explicit k.T.
        s = jnp.einsum("bqd,bkd->bqk", q, k,
                       preferred_element_type=jnp.float32)         # (Bb, T, T) f32
        s = jnp.where(causal, s, neg_big)
        s = s - jnp.max(s, axis=-1, keepdims=True)
        p = jnp.exp(s)
        p = p * pl.reciprocal(jnp.sum(p, axis=-1, keepdims=True), approx=True)
        # TODO(synk): attention-weight dropout skipped (eval mode => identity).

        head_out = jnp.einsum("bqk,bkd->bqd", p.astype(jnp.bfloat16), v,
                              preferred_element_type=jnp.float32)  # (Bb, T, hs)

        acc = acc + jnp.einsum("btd,de->bte",
                               head_out.astype(jnp.bfloat16), wp_ref[h],
                               preferred_element_type=jnp.float32)  # (Bb, T, E)

    out = acc + bp_ref[...].astype(jnp.float32)                    # bias broadcast
    # TODO(synk): output dropout skipped (eval mode => identity).
    o_ref[...] = out.astype(o_ref.dtype)


def _pick_batch_block(B):
    for bb in (8, 4, 2, 1):
        if B % bb == 0:
            return bb
    return 1


def multi_head_attention(x, wq, wk, wv, w_proj, b_proj):
    """x: (B, T, E); wq/wk/wv: (H, E, hs); w_proj: (E, E); b_proj: (E,)."""
    B, T, E = x.shape
    H, _, hs = wq.shape
    assert H * hs == E

    scale = 1.0 / math.sqrt(hs)

    # Fuse the per-head Q/K/V weights into one (E, 3E) matrix (head-major
    # columns), folding the 1/sqrt(hs) scale into the Q columns.  Reshape the
    # projection weight to (H, hs, E) so the head concat can be folded into a
    # per-head projection accumulation inside the kernel.
    wq_full = (wq * scale).transpose(1, 0, 2).reshape(E, E)        # (E, H*hs)
    wk_full = wk.transpose(1, 0, 2).reshape(E, E)
    wv_full = wv.transpose(1, 0, 2).reshape(E, E)
    w_qkv = jnp.concatenate([wq_full, wk_full, wv_full], axis=1).astype(jnp.bfloat16)
    wp_heads = w_proj.reshape(H, hs, E).astype(jnp.bfloat16)
    b_proj2d = b_proj.reshape(1, E).astype(jnp.float32)

    Bb = _pick_batch_block(B)            # several batch rows per grid step
    kernel = functools.partial(_mha_kernel, num_heads=H, head_size=hs)

    # NOTE: the weight BlockSpecs have constant index maps; for very large E
    # on v7x (64 MiB VMEM) consider single-buffering them (pl.Buffered(1)) or
    # tiling the projection's contraction dimension via an extra grid axis.
    return pl.pallas_call(
        kernel,
        out_shape=jax.ShapeDtypeStruct((B, T, E), x.dtype),
        grid_spec=pltpu.PrefetchScalarGridSpec(
            num_scalar_prefetch=0,
            grid=(B // Bb,),
            in_specs=[
                pl.BlockSpec((Bb, T, E), lambda b: (b, 0, 0)),     # x
                pl.BlockSpec((E, 3 * E), lambda b: (0, 0)),        # fused W_qkv
                pl.BlockSpec((H, hs, E), lambda b: (0, 0, 0)),     # W_proj per head
                pl.BlockSpec((1, E), lambda b: (0, 0)),            # b_proj
            ],
            out_specs=pl.BlockSpec((Bb, T, E), lambda b: (b, 0, 0)),
        ),
        compiler_params=pltpu.CompilerParams(
            dimension_semantics=("parallel",)),
    )(x, w_qkv, wp_heads, b_proj2d)


def reference_mha(x, wq, wk, wv, w_proj, b_proj):
    """Pure-JAX f32 reference mirroring the PyTorch forward (eval mode)."""
    B, T, E = x.shape
    H, _, hs = wq.shape
    scale = 1.0 / (hs ** 0.5)
    outs = []
    for h in range(H):
        q = x @ wq[h]
        k = x @ wk[h]
        v = x @ wv[h]
        s = jnp.einsum("btd,bsd->bts", q, k) * scale
        mask = jnp.tril(jnp.ones((T, T), bool))
        s = jnp.where(mask[None], s, -jnp.inf)
        p = jax.nn.softmax(s, axis=-1)
        outs.append(jnp.einsum("bts,bsd->btd", p, v))
    cat = jnp.concatenate(outs, axis=-1)
    return cat @ w_proj + b_proj


if __name__ == "__main__":
    # Small shapes consistent with the module: num_heads=4, block_size(T)=8,
    # embedding_size(E)=32 -> head_size=8; dropout inactive (eval).
    B, T, E, H = 2, 8, 32, 4
    hs = E // H

    key = jax.random.PRNGKey(0)
    kx, kq, kk, kv, kw, kb = jax.random.split(key, 6)

    x = jax.random.normal(kx, (B, T, E), dtype=jnp.float32)
    wq = jax.random.normal(kq, (H, E, hs), dtype=jnp.float32) * 0.1
    wk = jax.random.normal(kk, (H, E, hs), dtype=jnp.float32) * 0.1
    wv = jax.random.normal(kv, (H, E, hs), dtype=jnp.float32) * 0.1
    w_proj = jax.random.normal(kw, (E, E), dtype=jnp.float32) * 0.1
    b_proj = jax.random.normal(kb, (E,), dtype=jnp.float32) * 0.1

    out = multi_head_attention(x, wq, wk, wv, w_proj, b_proj)
    out = jax.block_until_ready(out)

    ref = reference_mha(x, wq, wk, wv, w_proj, b_proj)
    assert out.shape == (B, T, E)
    # bf16 MXU operands (f32 accumulation) => relaxed tolerance vs f32 reference.
    assert jnp.allclose(out, ref, atol=3e-2, rtol=3e-2), "mismatch vs reference"

    print("KERNEL_OK")
</pallas_src>

<mosaic_0001>
module attributes {stable_mosaic.version = 11 : i64} {
  func.func @_mha_kernel(%arg0: i32, %arg1: memref<2x8x32xf32, #tpu.memory_space<vmem>>, %arg2: memref<32x96xbf16, #tpu.memory_space<vmem>>, %arg3: memref<4x8x32xbf16, #tpu.memory_space<vmem>>, %arg4: memref<1x32xf32, #tpu.memory_space<vmem>>, %arg5: memref<2x8x32xf32, #tpu.memory_space<vmem>>) attributes {dimension_semantics = [#tpu.dimension_semantics<parallel>], iteration_bounds = array<i64: 1>, scalar_prefetch = 0 : i64, scratch_operands = 0 : i64, tpu.core_type = #tpu.core_type<tc>, window_params = [{transform_indices = @transform_0, window_bounds = array<i64: 2, 8, 32>}, {pipeline_mode = #tpu.pipeline_mode<synchronous>, transform_indices = @transform_1, window_bounds = array<i64: 32, 96>}, {pipeline_mode = #tpu.pipeline_mode<synchronous>, transform_indices = @transform_2, window_bounds = array<i64: 4, 8, 32>}, {pipeline_mode = #tpu.pipeline_mode<synchronous>, transform_indices = @transform_3, window_bounds = array<i64: 1, 32>}, {transform_indices = @transform_4, window_bounds = array<i64: 2, 8, 32>}]} {
    %c0 = arith.constant 0 : index
    %c0_0 = arith.constant 0 : index
    %c0_1 = arith.constant 0 : index
    %0 = vector.load %arg1[%c0, %c0_0, %c0_1] : memref<2x8x32xf32, #tpu.memory_space<vmem>>, vector<2x8x32xf32>
    %1 = arith.truncf %0 : vector<2x8x32xf32> to vector<2x8x32xbf16>
    %c0_2 = arith.constant 0 : index
    %c0_3 = arith.constant 0 : index
    %2 = vector.load %arg2[%c0_2, %c0_3] : memref<32x96xbf16, #tpu.memory_space<vmem>>, vector<32x96xbf16>
    "tpu.trace_start"() <{level = 10 : i32, message = "bte,ef->btf"}> : () -> ()
    %cst = arith.constant dense<0.000000e+00> : vector<2x8x96xf32>
    %3 = tpu.matmul %1, %2, %cst {dimension_numbers = #tpu.dot_dimension_numbers<[2], [0], [0, 1], [1], [0, 0, 0, 1, 1, 1], [], []>} : vector<2x8x32xbf16>, vector<32x96xbf16>, vector<2x8x96xf32> -> vector<2x8x96xf32>
    "tpu.trace_stop"() : () -> ()
    %4 = tpu.iota {dimensions = array<i32: 0>} : vector<8x8xi32>
    %5 = tpu.iota {dimensions = array<i32: 1>} : vector<8x8xi32>
    %6 = arith.cmpi sle, %5, %4 : vector<8x8xi32>
    %7 = vector.shape_cast %6 : vector<8x8xi1> to vector<1x8x8xi1>
    %cst_4 = arith.constant 0.000000e+00 : f32
    %8 = vector.broadcast %cst_4 : f32 to vector<2x8x32xf32>
    %9 = vector.extract_strided_slice %3 {offsets = [0, 0, 0], sizes = [2, 8, 8], strides = [1, 1, 1]} : vector<2x8x96xf32> to vector<2x8x8xf32>
    %10 = arith.truncf %9 : vector<2x8x8xf32> to vector<2x8x8xbf16>
    %11 = vector.extract_strided_slice %3 {offsets = [0, 0, 32], sizes = [2, 8, 8], strides = [1, 1, 1]} : vector<2x8x96xf32> to vector<2x8x8xf32>
    %12 = arith.truncf %11 : vector<2x8x8xf32> to vector<2x8x8xbf16>
    %13 = vector.extract_strided_slice %3 {offsets = [0, 0, 64], sizes = [2, 8, 8], strides = [1, 1, 1]} : vector<2x8x96xf32> to vector<2x8x8xf32>
    %14 = arith.truncf %13 : vector<2x8x8xf32> to vector<2x8x8xbf16>
    "tpu.trace_start"() <{level = 10 : i32, message = "bqd,bkd->bqk"}> : () -> ()
    %cst_5 = arith.constant dense<0.000000e+00> : vector<2x8x8xf32>
    %15 = tpu.matmul %10, %12, %cst_5 {dimension_numbers = #tpu.dot_dimension_numbers<[2], [2], [1], [1], [0, 0, 0, 1, 1, 1], [0], [0]>} : vector<2x8x8xbf16>, vector<2x8x8xbf16>, vector<2x8x8xf32> -> vector<2x8x8xf32>
    %cst_6 = arith.constant -1.000000e+30 : f32
    "tpu.trace_stop"() : () -> ()
    %16 = vector.shape_cast %7 : vector<1x8x8xi1> to vector<1x8x8xi1>
    %17 = vector.broadcast %16 : vector<1x8x8xi1> to vector<2x8x8xi1>
    %18 = vector.broadcast %cst_6 : f32 to vector<2x8x8xf32>
    %19 = arith.select %17, %15, %18 : vector<2x8x8xi1>, vector<2x8x8xf32>
    %cst_7 = arith.constant dense<0xFF800000> : vector<2x8xf32>
    %20 = vector.multi_reduction <maximumf>, %19, %cst_7 [2] : vector<2x8x8xf32> to vector<2x8xf32>
    %21 = vector.shape_cast %20 : vector<2x8xf32> to vector<2x8x1xf32>
    %22 = vector.broadcast %21 : vector<2x8x1xf32> to vector<2x8x8xf32>
    %23 = arith.subf %19, %22 : vector<2x8x8xf32>
    %24 = math.exp %23 : vector<2x8x8xf32>
    %cst_8 = arith.constant dense<0.000000e+00> : vector<2x8xf32>
    %25 = vector.multi_reduction <add>, %24, %cst_8 [2] : vector<2x8x8xf32> to vector<2x8xf32>
    %26 = vector.shape_cast %25 : vector<2x8xf32> to vector<2x8x1xf32>
    %27 = tpu.reciprocal %26 {approx = true} : vector<2x8x1xf32> -> vector<2x8x1xf32>
    %28 = vector.broadcast %27 : vector<2x8x1xf32> to vector<2x8x8xf32>
    %29 = arith.mulf %24, %28 : vector<2x8x8xf32>
    %30 = arith.truncf %29 : vector<2x8x8xf32> to vector<2x8x8xbf16>
    "tpu.trace_start"() <{level = 10 : i32, message = "bqk,bkd->bqd"}> : () -> ()
    %cst_9 = arith.constant dense<0.000000e+00> : vector<2x8x8xf32>
    %31 = tpu.matmul %30, %14, %cst_9 {dimension_numbers = #tpu.dot_dimension_numbers<[2], [1], [1], [2], [0, 0, 0, 1, 1, 2], [0], [0]>} : vector<2x8x8xbf16>, vector<2x8x8xbf16>, vector<2x8x8xf32> -> vector<2x8x8xf32>
    "tpu.trace_stop"() : () -> ()
    %32 = arith.truncf %31 : vector<2x8x8xf32> to vector<2x8x8xbf16>
    %c0_10 = arith.constant 0 : index
    %c0_11 = arith.constant 0 : index
    %c0_12 = arith.constant 0 : index
    %33 = vector.load %arg3[%c0_10, %c0_11, %c0_12] : memref<4x8x32xbf16, #tpu.memory_space<vmem>>, vector<1x8x32xbf16>
    %34 = vector.shape_cast %33 : vector<1x8x32xbf16> to vector<8x32xbf16>
    "tpu.trace_start"() <{level = 10 : i32, message = "btd,de->bte"}> : () -> ()
    %cst_13 = arith.constant dense<0.000000e+00> : vector<2x8x32xf32>
    %35 = tpu.matmul %32, %34, %cst_13 {dimension_numbers = #tpu.dot_dimension_numbers<[2], [0], [0, 1], [1], [0, 0, 0, 1, 1, 1], [], []>} : vector<2x8x8xbf16>, vector<8x32xbf16>, vector<2x8x32xf32> -> vector<2x8x32xf32>
    "tpu.trace_stop"() : () -> ()
    %36 = arith.addf %8, %35 : vector<2x8x32xf32>
    %37 = vector.extract_strided_slice %3 {offsets = [0, 0, 8], sizes = [2, 8, 8], strides = [1, 1, 1]} : vector<2x8x96xf32> to vector<2x8x8xf32>
    %38 = arith.truncf %37 : vector<2x8x8xf32> to vector<2x8x8xbf16>
    %39 = vector.extract_strided_slice %3 {offsets = [0, 0, 40], sizes = [2, 8, 8], strides = [1, 1, 1]} : vector<2x8x96xf32> to vector<2x8x8xf32>
    %40 = arith.truncf %39 : vector<2x8x8xf32> to vector<2x8x8xbf16>
    %41 = vector.extract_strided_slice %3 {offsets = [0, 0, 72], sizes = [2, 8, 8], strides = [1, 1, 1]} : vector<2x8x96xf32> to vector<2x8x8xf32>
    %42 = arith.truncf %41 : vector<2x8x8xf32> to vector<2x8x8xbf16>
    "tpu.trace_start"() <{level = 10 : i32, message = "bqd,bkd->bqk"}> : () -> ()
    %cst_14 = arith.constant dense<0.000000e+00> : vector<2x8x8xf32>
    %43 = tpu.matmul %38, %40, %cst_14 {dimension_numbers = #tpu.dot_dimension_numbers<[2], [2], [1], [1], [0, 0, 0, 1, 1, 1], [0], [0]>} : vector<2x8x8xbf16>, vector<2x8x8xbf16>, vector<2x8x8xf32> -> vector<2x8x8xf32>
    %cst_15 = arith.constant -1.000000e+30 : f32
    "tpu.trace_stop"() : () -> ()
    %44 = vector.shape_cast %7 : vector<1x8x8xi1> to vector<1x8x8xi1>
    %45 = vector.broadcast %44 : vector<1x8x8xi1> to vector<2x8x8xi1>
    %46 = vector.broadcast %cst_15 : f32 to vector<2x8x8xf32>
    %47 = arith.select %45, %43, %46 : vector<2x8x8xi1>, vector<2x8x8xf32>
    %cst_16 = arith.constant dense<0xFF800000> : vector<2x8xf32>
    %48 = vector.multi_reduction <maximumf>, %47, %cst_16 [2] : vector<2x8x8xf32> to vector<2x8xf32>
    %49 = vector.shape_cast %48 : vector<2x8xf32> to vector<2x8x1xf32>
    %50 = vector.broadcast %49 : vector<2x8x1xf32> to vector<2x8x8xf32>
    %51 = arith.subf %47, %50 : vector<2x8x8xf32>
    %52 = math.exp %51 : vector<2x8x8xf32>
    %cst_17 = arith.constant dense<0.000000e+00> : vector<2x8xf32>
    %53 = vector.multi_reduction <add>, %52, %cst_17 [2] : vector<2x8x8xf32> to vector<2x8xf32>
    %54 = vector.shape_cast %53 : vector<2x8xf32> to vector<2x8x1xf32>
    %55 = tpu.reciprocal %54 {approx = true} : vector<2x8x1xf32> -> vector<2x8x1xf32>
    %56 = vector.broadcast %55 : vector<2x8x1xf32> to vector<2x8x8xf32>
    %57 = arith.mulf %52, %56 : vector<2x8x8xf32>
    %58 = arith.truncf %57 : vector<2x8x8xf32> to vector<2x8x8xbf16>
    "tpu.trace_start"() <{level = 10 : i32, message = "bqk,bkd->bqd"}> : () -> ()
    %cst_18 = arith.constant dense<0.000000e+00> : vector<2x8x8xf32>
    %59 = tpu.matmul %58, %42, %cst_18 {dimension_numbers = #tpu.dot_dimension_numbers<[2], [1], [1], [2], [0, 0, 0, 1, 1, 2], [0], [0]>} : vector<2x8x8xbf16>, vector<2x8x8xbf16>, vector<2x8x8xf32> -> vector<2x8x8xf32>
    "tpu.trace_stop"() : () -> ()
    %60 = arith.truncf %59 : vector<2x8x8xf32> to vector<2x8x8xbf16>
    %c1 = arith.constant 1 : index
    %c0_19 = arith.constant 0 : index
    %c0_20 = arith.constant 0 : index
    %61 = vector.load %arg3[%c1, %c0_19, %c0_20] : memref<4x8x32xbf16, #tpu.memory_space<vmem>>, vector<1x8x32xbf16>
    %62 = vector.shape_cast %61 : vector<1x8x32xbf16> to vector<8x32xbf16>
    "tpu.trace_start"() <{level = 10 : i32, message = "btd,de->bte"}> : () -> ()
    %cst_21 = arith.constant dense<0.000000e+00> : vector<2x8x32xf32>
    %63 = tpu.matmul %60, %62, %cst_21 {dimension_numbers = #tpu.dot_dimension_numbers<[2], [0], [0, 1], [1], [0, 0, 0, 1, 1, 1], [], []>} : vector<2x8x8xbf16>, vector<8x32xbf16>, vector<2x8x32xf32> -> vector<2x8x32xf32>
    "tpu.trace_stop"() : () -> ()
    %64 = arith.addf %36, %63 : vector<2x8x32xf32>
    %65 = vector.extract_strided_slice %3 {offsets = [0, 0, 16], sizes = [2, 8, 8], strides = [1, 1, 1]} : vector<2x8x96xf32> to vector<2x8x8xf32>
    %66 = arith.truncf %65 : vector<2x8x8xf32> to vector<2x8x8xbf16>
    %67 = vector.extract_strided_slice %3 {offsets = [0, 0, 48], sizes = [2, 8, 8], strides = [1, 1, 1]} : vector<2x8x96xf32> to vector<2x8x8xf32>
    %68 = arith.truncf %67 : vector<2x8x8xf32> to vector<2x8x8xbf16>
    %69 = vector.extract_strided_slice %3 {offsets = [0, 0, 80], sizes = [2, 8, 8], strides = [1, 1, 1]} : vector<2x8x96xf32> to vector<2x8x8xf32>
    %70 = arith.truncf %69 : vector<2x8x8xf32> to vector<2x8x8xbf16>
    "tpu.trace_start"() <{level = 10 : i32, message = "bqd,bkd->bqk"}> : () -> ()
    %cst_22 = arith.constant dense<0.000000e+00> : vector<2x8x8xf32>
    %71 = tpu.matmul %66, %68, %cst_22 {dimension_numbers = #tpu.dot_dimension_numbers<[2], [2], [1], [1], [0, 0, 0, 1, 1, 1], [0], [0]>} : vector<2x8x8xbf16>, vector<2x8x8xbf16>, vector<2x8x8xf32> -> vector<2x8x8xf32>
    %cst_23 = arith.constant -1.000000e+30 : f32
    "tpu.trace_stop"() : () -> ()
    %72 = vector.shape_cast %7 : vector<1x8x8xi1> to vector<1x8x8xi1>
    %73 = vector.broadcast %72 : vector<1x8x8xi1> to vector<2x8x8xi1>
    %74 = vector.broadcast %cst_23 : f32 to vector<2x8x8xf32>
    %75 = arith.select %73, %71, %74 : vector<2x8x8xi1>, vector<2x8x8xf32>
    %cst_24 = arith.constant dense<0xFF800000> : vector<2x8xf32>
    %76 = vector.multi_reduction <maximumf>, %75, %cst_24 [2] : vector<2x8x8xf32> to vector<2x8xf32>
    %77 = vector.shape_cast %76 : vector<2x8xf32> to vector<2x8x1xf32>
    %78 = vector.broadcast %77 : vector<2x8x1xf32> to vector<2x8x8xf32>
    %79 = arith.subf %75, %78 : vector<2x8x8xf32>
    %80 = math.exp %79 : vector<2x8x8xf32>
    %cst_25 = arith.constant dense<0.000000e+00> : vector<2x8xf32>
    %81 = vector.multi_reduction <add>, %80, %cst_25 [2] : vector<2x8x8xf32> to vector<2x8xf32>
    %82 = vector.shape_cast %81 : vector<2x8xf32> to vector<2x8x1xf32>
    %83 = tpu.reciprocal %82 {approx = true} : vector<2x8x1xf32> -> vector<2x8x1xf32>
    %84 = vector.broadcast %83 : vector<2x8x1xf32> to vector<2x8x8xf32>
    %85 = arith.mulf %80, %84 : vector<2x8x8xf32>
    %86 = arith.truncf %85 : vector<2x8x8xf32> to vector<2x8x8xbf16>
    "tpu.trace_start"() <{level = 10 : i32, message = "bqk,bkd->bqd"}> : () -> ()
    %cst_26 = arith.constant dense<0.000000e+00> : vector<2x8x8xf32>
    %87 = tpu.matmul %86, %70, %cst_26 {dimension_numbers = #tpu.dot_dimension_numbers<[2], [1], [1], [2], [0, 0, 0, 1, 1, 2], [0], [0]>} : vector<2x8x8xbf16>, vector<2x8x8xbf16>, vector<2x8x8xf32> -> vector<2x8x8xf32>
    "tpu.trace_stop"() : () -> ()
    %88 = arith.truncf %87 : vector<2x8x8xf32> to vector<2x8x8xbf16>
    %c2 = arith.constant 2 : index
    %c0_27 = arith.constant 0 : index
    %c0_28 = arith.constant 0 : index
    %89 = vector.load %arg3[%c2, %c0_27, %c0_28] : memref<4x8x32xbf16, #tpu.memory_space<vmem>>, vector<1x8x32xbf16>
    %90 = vector.shape_cast %89 : vector<1x8x32xbf16> to vector<8x32xbf16>
    "tpu.trace_start"() <{level = 10 : i32, message = "btd,de->bte"}> : () -> ()
    %cst_29 = arith.constant dense<0.000000e+00> : vector<2x8x32xf32>
    %91 = tpu.matmul %88, %90, %cst_29 {dimension_numbers = #tpu.dot_dimension_numbers<[2], [0], [0, 1], [1], [0, 0, 0, 1, 1, 1], [], []>} : vector<2x8x8xbf16>, vector<8x32xbf16>, vector<2x8x32xf32> -> vector<2x8x32xf32>
    "tpu.trace_stop"() : () -> ()
    %92 = arith.addf %64, %91 : vector<2x8x32xf32>
    %93 = vector.extract_strided_slice %3 {offsets = [0, 0, 24], sizes = [2, 8, 8], strides = [1, 1, 1]} : vector<2x8x96xf32> to vector<2x8x8xf32>
    %94 = arith.truncf %93 : vector<2x8x8xf32> to vector<2x8x8xbf16>
    %95 = vector.extract_strided_slice %3 {offsets = [0, 0, 56], sizes = [2, 8, 8], strides = [1, 1, 1]} : vector<2x8x96xf32> to vector<2x8x8xf32>
    %96 = arith.truncf %95 : vector<2x8x8xf32> to vector<2x8x8xbf16>
    %97 = vector.extract_strided_slice %3 {offsets = [0, 0, 88], sizes = [2, 8, 8], strides = [1, 1, 1]} : vector<2x8x96xf32> to vector<2x8x8xf32>
    %98 = arith.truncf %97 : vector<2x8x8xf32> to vector<2x8x8xbf16>
    "tpu.trace_start"() <{level = 10 : i32, message = "bqd,bkd->bqk"}> : () -> ()
    %cst_30 = arith.constant dense<0.000000e+00> : vector<2x8x8xf32>
    %99 = tpu.matmul %94, %96, %cst_30 {dimension_numbers = #tpu.dot_dimension_numbers<[2], [2], [1], [1], [0, 0, 0, 1, 1, 1], [0], [0]>} : vector<2x8x8xbf16>, vector<2x8x8xbf16>, vector<2x8x8xf32> -> vector<2x8x8xf32>
    %cst_31 = arith.constant -1.000000e+30 : f32
    "tpu.trace_stop"() : () -> ()
    %100 = vector.shape_cast %7 : vector<1x8x8xi1> to vector<1x8x8xi1>
    %101 = vector.broadcast %100 : vector<1x8x8xi1> to vector<2x8x8xi1>
    %102 = vector.broadcast %cst_31 : f32 to vector<2x8x8xf32>
    %103 = arith.select %101, %99, %102 : vector<2x8x8xi1>, vector<2x8x8xf32>
    %cst_32 = arith.constant dense<0xFF800000> : vector<2x8xf32>
    %104 = vector.multi_reduction <maximumf>, %103, %cst_32 [2] : vector<2x8x8xf32> to vector<2x8xf32>
    %105 = vector.shape_cast %104 : vector<2x8xf32> to vector<2x8x1xf32>
    %106 = vector.broadcast %105 : vector<2x8x1xf32> to vector<2x8x8xf32>
    %107 = arith.subf %103, %106 : vector<2x8x8xf32>
    %108 = math.exp %107 : vector<2x8x8xf32>
    %cst_33 = arith.constant dense<0.000000e+00> : vector<2x8xf32>
    %109 = vector.multi_reduction <add>, %108, %cst_33 [2] : vector<2x8x8xf32> to vector<2x8xf32>
    %110 = vector.shape_cast %109 : vector<2x8xf32> to vector<2x8x1xf32>
    %111 = tpu.reciprocal %110 {approx = true} : vector<2x8x1xf32> -> vector<2x8x1xf32>
    %112 = vector.broadcast %111 : vector<2x8x1xf32> to vector<2x8x8xf32>
    %113 = arith.mulf %108, %112 : vector<2x8x8xf32>
    %114 = arith.truncf %113 : vector<2x8x8xf32> to vector<2x8x8xbf16>
    "tpu.trace_start"() <{level = 10 : i32, message = "bqk,bkd->bqd"}> : () -> ()
    %cst_34 = arith.constant dense<0.000000e+00> : vector<2x8x8xf32>
    %115 = tpu.matmul %114, %98, %cst_34 {dimension_numbers = #tpu.dot_dimension_numbers<[2], [1], [1], [2], [0, 0, 0, 1, 1, 2], [0], [0]>} : vector<2x8x8xbf16>, vector<2x8x8xbf16>, vector<2x8x8xf32> -> vector<2x8x8xf32>
    "tpu.trace_stop"() : () -> ()
    %116 = arith.truncf %115 : vector<2x8x8xf32> to vector<2x8x8xbf16>
    %c3 = arith.constant 3 : index
    %c0_35 = arith.constant 0 : index
    %c0_36 = arith.constant 0 : index
    %117 = vector.load %arg3[%c3, %c0_35, %c0_36] : memref<4x8x32xbf16, #tpu.memory_space<vmem>>, vector<1x8x32xbf16>
    %118 = vector.shape_cast %117 : vector<1x8x32xbf16> to vector<8x32xbf16>
    "tpu.trace_start"() <{level = 10 : i32, message = "btd,de->bte"}> : () -> ()
    %cst_37 = arith.constant dense<0.000000e+00> : vector<2x8x32xf32>
    %119 = tpu.matmul %116, %118, %cst_37 {dimension_numbers = #tpu.dot_dimension_numbers<[2], [0], [0, 1], [1], [0, 0, 0, 1, 1, 1], [], []>} : vector<2x8x8xbf16>, vector<8x32xbf16>, vector<2x8x32xf32> -> vector<2x8x32xf32>
    "tpu.trace_stop"() : () -> ()
    %120 = arith.addf %92, %119 : vector<2x8x32xf32>
    %c0_38 = arith.constant 0 : index
    %c0_39 = arith.constant 0 : index
    %121 = vector.load %arg4[%c0_38, %c0_39] : memref<1x32xf32, #tpu.memory_space<vmem>>, vector<1x32xf32>
    %122 = vector.shape_cast %121 : vector<1x32xf32> to vector<1x1x32xf32>
    %123 = vector.broadcast %122 : vector<1x1x32xf32> to vector<2x8x32xf32>
    %124 = arith.addf %120, %123 : vector<2x8x32xf32>
    %c0_40 = arith.constant 0 : index
    %c0_41 = arith.constant 0 : index
    %c0_42 = arith.constant 0 : index
    %125 = vector.load %arg5[%c0_40, %c0_41, %c0_42] : memref<2x8x32xf32, #tpu.memory_space<vmem>>, vector<2x8x32xf32>
    tpu.vector_store %arg5[%c0_40, %c0_41, %c0_42], %124 {strides = array<i32>} : memref<2x8x32xf32, #tpu.memory_space<vmem>>, vector<2x8x32xf32>,
    return
  }
  func.func @transform_0(%arg0: i32) -> (i32, i32, i32) {
    %c0_i32 = arith.constant 0 : i32
    %c0_i32_0 = arith.constant 0 : i32
    %c0_i32_1 = arith.constant 0 : i32
    return %arg0, %c0_i32, %c0_i32_0 : i32, i32, i32
  }
  func.func @transform_1(%arg0: i32) -> (i32, i32) {
    %c0_i32 = arith.constant 0 : i32
    %c0_i32_0 = arith.constant 0 : i32
    %c0_i32_1 = arith.constant 0 : i32
    return %c0_i32, %c0_i32_0 : i32, i32
  }
  func.func @transform_2(%arg0: i32) -> (i32, i32, i32) {
    %c0_i32 = arith.constant 0 : i32
    %c0_i32_0 = arith.constant 0 : i32
    %c0_i32_1 = arith.constant 0 : i32
    %c0_i32_2 = arith.constant 0 : i32
    return %c0_i32, %c0_i32_0, %c0_i32_1 : i32, i32, i32
  }
  func.func @transform_3(%arg0: i32) -> (i32, i32) {
    %c0_i32 = arith.constant 0 : i32
    %c0_i32_0 = arith.constant 0 : i32
    %c0_i32_1 = arith.constant 0 : i32
    return %c0_i32, %c0_i32_0 : i32, i32
  }
  func.func @transform_4(%arg0: i32) -> (i32, i32, i32) {
    %c0_i32 = arith.constant 0 : i32
    %c0_i32_0 = arith.constant 0 : i32
    %c0_i32_1 = arith.constant 0 : i32
    return %arg0, %c0_i32, %c0_i32_0 : i32, i32, i32
  }
}

</mosaic_0001>

<bundles_post_ra>
// kernel: tpu_custom_call.1
= control target key start
LH: loop header
LB: loop body
LE: loop exit
PB: predicated region body
PF: predicated region fallthrough
CT: control target
= control target key end

     0   :  { %9 = vsyncpa [#allocation3], 0  ;;  %s1936_s0 = inlined_call_operand.hbm [shape: f32[2,8,32], index: 0, kind: input, shape index: {}]   ;;  %s1937_s1 = inlined_call_operand.hbm [shape: bf16[32,96], index: 1, kind: input, shape index: {}]   ;;  %s1938_s2 = inlined_call_operand.hbm [shape: bf16[4,8,32], index: 2, kind: input, shape index: {}]   ;;  %s1939_s3 = inlined_call_operand.vmem [shape: f32[1,32], index: 3, kind: input, shape index: {}]   ;;  %s1940_s4 = inlined_call_operand.hbm [shape: f32[2,8,32], index: 4, kind: output, shape index: {}]  }
   0x1   :  { %10 = vsyncpa [#allocation6], 0 }
   0x2   :  { %11 = vsyncpa [#allocation4], 0  ;;  %s1636_s15 = smov [#allocation5]   ;;  %s1542_s19 = scalar_lea.hbm %s1937_s1, 256 }
   0x3   :  { %s29_s16 = sshll.u32 %s1636_s15, 4  ;;  %p1543_p0 = scmp.ne.s32.totalorder %s1937_s1, %s1542_s19  ;;  %s30_s16 = int_to_ptr.vmem [resolvable:$true] %s29_s16 }
   0x4   :  { %p1546_p1 = scmp.lt.u32.totalorder %s1542_s19, %s1937_s1 }
   0x6   :  { %p1548_p2 = pnand %p1546_p1, %p1543_p0 }
   0x8   :  { %1551 = shalt.err (!%p1548_p2)
}
   0x9   :  { %s1552_s24 = scalar_lea.vmem %s30_s16, 256  ;;  %p1557_p4 = scmp.lt.s32.totalorder %s30_s16, %s30_s16 }
   0xa   :  { %p1553_p3 = scmp.ne.s32.totalorder %s30_s16, %s1552_s24  ;;  %p1558_p5 = scmp.lt.s32.totalorder %s1552_s24, %s1552_s24 }
   0xc   :  { %p1559_p6 = por %p1558_p5, %p1557_p4 }
   0xe   :  { %p1560_p7 = pnand %p1559_p6, %p1553_p3 }
  0x10   :  { %1563 = shalt.err (!%p1560_p7)
}
  0x11   :  { %s1637_s25 = smov 64   ;;  %s1638_s26 = smov 4  }
  0x12   :  { %35 = dma.hbm_to_vmem [thread:$0]  %s1937_s1, 256, %s30_s16, [#allocation6], %s1637_s25, %s1637_s25, %s1638_s26  }
  0x13   :  { %s1639_s29 = smov [#allocation2]   ;;  %s1564_s7 = scalar_lea.hbm %s1936_s0, 256 }
  0x14   :  { %s17_s30 = sshll.u32 %s1639_s29, 4  ;;  %p1565_p8 = scmp.ne.s32.totalorder %s1936_s0, %s1564_s7  ;;  %s18_s30 = int_to_ptr.vmem [resolvable:$true] %s17_s30 }
  0x15   :  { %p1568_p9 = scmp.lt.u32.totalorder %s1564_s7, %s1936_s0 }
  0x17   :  { %p1570_p10 = pnand %p1568_p9, %p1565_p8 }
  0x19   :  { %1573 = shalt.err (!%p1570_p10)
}
  0x1a   :  { %s1574_s12 = scalar_lea.vmem %s18_s30, 256  ;;  %p1579_p12 = scmp.lt.s32.totalorder %s18_s30, %s18_s30 }
  0x1b   :  { %p1575_p11 = scmp.ne.s32.totalorder %s18_s30, %s1574_s12  ;;  %p1580_p13 = scmp.lt.s32.totalorder %s1574_s12, %s1574_s12 }
  0x1d   :  { %p1581_p0 = por %p1580_p13, %p1579_p12 }
  0x1f   :  { %p1582_p1 = pnand %p1581_p0, %p1575_p11 }
  0x21   :  { %1585 = shalt.err (!%p1582_p1)
}
  0x22   :  { %s1640_s1 = smov 128   ;;  %s1641_s13 = smov 8  }
  0x23   :  { %23 = dma.hbm_to_vmem [thread:$0]  %s1936_s0, 256, %s18_s30, [#allocation3], %s1640_s1, %s1640_s1, %s1641_s13  }
  0x24   :  { %s1642_s16 = smov [#allocation7]   ;;  %s1586_s20 = scalar_lea.hbm %s1938_s2, 256 }
  0x25   :  { %s41_s17 = sshll.u32 %s1642_s16, 4  ;;  %p1587_p2 = scmp.ne.s32.totalorder %s1938_s2, %s1586_s20  ;;  %s42_s17 = int_to_ptr.vmem [resolvable:$true] %s41_s17 }
  0x26   :  { %p1590_p3 = scmp.lt.u32.totalorder %s1586_s20, %s1938_s2 }
  0x28   :  { %p1592_p4 = pnand %p1590_p3, %p1587_p2 }
  0x2a   :  { %1595 = shalt.err (!%p1592_p4)
}
  0x2b   :  { %s1596_s27 = scalar_lea.vmem %s42_s17, 256  ;;  %p1601_p6 = scmp.lt.s32.totalorder %s42_s17, %s42_s17 }
  0x2c   :  { %p1597_p5 = scmp.ne.s32.totalorder %s42_s17, %s1596_s27  ;;  %p1602_p7 = scmp.lt.s32.totalorder %s1596_s27, %s1596_s27 }
  0x2e   :  { %p1603_p8 = por %p1602_p7, %p1601_p6 }
  0x30   :  { %p1604_p9 = pnand %p1603_p8, %p1597_p5 }
  0x32   :  { %1607 = shalt.err (!%p1604_p9)
}
  0x33   :  { %47 = dma.hbm_to_vmem [thread:$0]  %s1938_s2, 256, %s42_s17, [#allocation6], %s1637_s25, %s1637_s25, %s1638_s26  }
  0x34   :  { %1630 = dma.done.wait [#allocation3], 256  }
  0x35   :  { %1631 = vsyncadd [#allocation3], 4294967040 }
  0x36   :  { %1632 = dma.done.wait [#allocation6], 512  }
  0x37   :  { %1633 = vsyncadd [#allocation6], 4294966784  ;;  %v1643_v0 = vmov 0.0   ;;  %vm1644_vm0 = vmmov 0   ;;  %v1508_v1 = vld [vmem:[#allocation5] sm:$0xff]   ;;  %v1509_v2 = vld [vmem:[#allocation5 + $0x8] sm:$0xff]   ;;  %v130_v16 = vlaneseq }
  0x38   :  { %1360 = vmatprep.subr.bf16.mxu0 %v1643_v0  ;;  %1364 = vmatprep.mubr.msk.bf16.mxu0 %vm1644_vm0, %v1643_v0  ;;  %v60_v3 = vld [vmem:[#allocation2] sm:$0xff]  ;;  %v61_v4 = vld [vmem:[#allocation2 + $0x8] sm:$0xff]  ;;  %vm85_vm1 = vcmask 261120   ;;  %s1645_s2 = smov 96   ;;  %vm140_vm2 = vcmask 64512   ;;  %s1646_s26 = smov 88  }
  0x39   :  { %1368 = vmatprep.subr.bf16.mxu1 %v1643_v0  ;;  %1370 = vmatprep.mubr.msk.bf16.mxu1 %vm1644_vm0, %v1643_v0  ;;  %v1312_v5 = vpack.c.bf16 %v61_v4, %v60_v3  ;;  %v131_v17 = vshrl.u32 %v130_v16, 7  ;;  %v133_v18 = vand.u32 127, %v130_v16  ;;  %vm269_vm4 = vcmask 1043456   ;;  %s1648_s29 = smov 56   ;;  %s1649_s30 = smov 112  }
  0x3a   :  { %1361 = vmatpush3.bf16.msra.mxu0 %v1508_v1  ;;  %s1650_s5 = smov 80   ;;  %s1651_s6 = smov 48  }
  0x3b   :  { %1362 = vmatprep.subr.bf16.mxu0 %v1643_v0  ;;  %vm1755_vm3 = vcmp.le.s32.totalorder %v133_v18, %v131_v17  ;;  %s1652_s7 = smov 72   ;;  %s1653_s8 = smov 104  }
  0x3c   :  { %s1654_s9 = smov 40   ;;  %s1655_s12 = smov [#allocation8]  }
  0x3d   :  { %s1270_s14 = sshll.u32 %s1655_s12, 4  ;;  %s1271_s14 = int_to_ptr.vmem [resolvable:$true] %s1270_s14 }
  0x3e   :  { %1363 = vmatpush3.bf16.msra.mxu0 %v1509_v2  ;;  %s1608_s15 = scalar_lea.vmem %s1271_s14, 256  ;;  %p1613_p11 = scmp.lt.s32.totalorder %s1271_s14, %s1271_s14 }
  0x3f   :  { %1374 = vmatprep.subr.bf16.mxu0 %v1643_v0  ;;  %p1609_p10 = scmp.ne.s32.totalorder %s1271_s14, %s1608_s15  ;;  %p1614_p12 = scmp.lt.s32.totalorder %s1608_s15, %s1608_s15 }
  0x41   :  { %1365 = vmatmul.mubr.msk.bf16.vlgmr.msra.gmra.mrb[0].mxu0 %vm85_vm1, %v1312_v5  ;;  %p1615_p13 = por %p1614_p12, %p1613_p11 }
  0x42   :  { %1376 = vmatprep.mubr.msk.bf16.mxu0 %vm1644_vm0, %v1643_v0 }
  0x43   :  { %p1616_p0 = pnand %p1615_p13, %p1609_p10 }
 0x114   :  { %v123_v6 = vpop.f32.mrb[0].mxu0 }
 0x115   :  { %v1737_v7 = vpack.c.bf16 %v123_v6, %v123_v6  ;;  %v1366_v8 = vpop.f32.mrb[1].mxu0 }
 0x116   :  { %v126_v9 = vpop.f32.mrb[2].mxu0 }
 0x117   :  { %138 = vrot.lane.b32.xlu0 %v1737_v7, %s1645_s2  ;;  %v1367_v10 = vpop.f32.mrb[3].mxu0  ;;  %v1740_v11 = vpack.c.bf16 %v126_v9, %v126_v9 }
 0x11b   :  { %188 = vrot.lane.b32.xlu0 %v1740_v11, %s1645_s2 }
 0x189   :  { %v139_v12 = vpop.permute.xlu0 %138 }
 0x18a   :  { %v145_v13 = vsel %vm140_vm2, %v139_v12, 0 }
 0x18b   :  { %1369 = vmatpush3.bf16.xpose.msra.mxu1 %v145_v13 }
 0x18c   :  { %1380 = vmatprep.subr.bf16.mxu1 %v1643_v0 }
 0x18d   :  { %v189_v14 = vpop.permute.xlu0 %188 }
 0x18e   :  { %v194_v15 = vsel %vm140_vm2, %v189_v14, 0 }
 0x18f   :  { %1375 = vmatpush3.bf16.xpose.msra.mxu0 %v194_v15 }
 0x190   :  { %1386 = vmatprep.subr.bf16.mxu0 %v1643_v0 }
 0x192   :  { %1371 = vmatmul.mubr.msk.bf16.vlgmr.msra.gmra.mrb[0].mxu1 %vm140_vm2, %v1737_v7 }
 0x193   :  { %1382 = vmatprep.mubr.msk.bf16.mxu1 %vm1644_vm0, %v1643_v0 }
 0x196   :  { %1377 = vmatmul.mubr.msk.bf16.vlgmr.msra.gmra.mrb[4].mxu0 %vm140_vm2, %v1740_v11 }
 0x197   :  { %1388 = vmatprep.mubr.msk.bf16.mxu0 %vm1644_vm0, %v1643_v0 }
 0x265   :  { %v181_v20 = vpop.f32.mrb[0].mxu1 }
 0x266   :  { %v238_v21 = vsel %vm1755_vm3, %v181_v20, -1e+30  ;;  %v1372_v22 = vpop.f32.mrb[1].mxu1 }
 0x267   :  { %v184_v23 = vpop.f32.mrb[2].mxu1  ;;  %v240_v24 = vsel %vm140_vm2, %v238_v21, -inf }
 0x268   :  { %241 = vmax.xlane.f32.xlu1 %v240_v24  ;;  %v1373_v25 = vpop.f32.mrb[3].mxu1 }
 0x269   :  { %v230_v26 = vpop.f32.mrb[4].mxu0 }
 0x26a   :  { %v239_v27 = vsel %vm1755_vm3, %v230_v26, -1e+30  ;;  %v1378_v28 = vpop.f32.mrb[5].mxu0 }
 0x26b   :  { %v233_v29 = vpop.f32.mrb[6].mxu0  ;;  %v243_v30 = vsel %vm140_vm2, %v239_v27, -inf }
 0x26c   :  { %244 = vmax.xlane.f32.xlu1 %v243_v30  ;;  %v1379_v31 = vpop.f32.mrb[7].mxu0 }
 0x27d   :  { %264 = vrot.lane.b32.xlu1 %v1737_v7, %s1637_s25 }
 0x281   :  { %313 = vrot.lane.b32.xlu1 %v1740_v11, %s1637_s25  ;;  %s1647_s25 = smov 120  }
 0x285   :  { %366 = vrot.lane.b32.xlu1 %v1737_v7, %s1646_s26 }
 0x2f5   :  { %v242_v32 = vpop.xlane.xlu1 %241 }
 0x2f6   :  { %v246_v33 = vsub.f32 %v238_v21, %v242_v32 }
 0x2f8   :  { %v248_v34 = vmul.f32 1.442695, %v246_v33 }
 0x2f9   :  { %v245_v35 = vpop.xlane.xlu1 %244 }
 0x2fa   :  { %1510 = vpow2.f32 %v248_v34  ;;  %v247_v36 = vsub.f32 %v239_v27, %v245_v35 }
 0x2fc   :  { %v250_v37 = vmul.f32 1.442695, %v247_v36 }
 0x2fd   :  { %v265_v38 = vpop.permute.xlu1 %264 }
 0x2fe   :  { %1512 = vpow2.f32 %v250_v37  ;;  %v271_v39 = vsel %vm269_vm4, %v265_v38, 0  ;;  %v589_v38 = vld [vmem:[#allocation7 + $0x4] sm:$0xf] }
 0x2ff   :  { %1381 = vmatpush3.bf16.msra.mxu1 %v271_v39 }
 0x300   :  { %1392 = vmatprep.subr.bf16.mxu1 %v1643_v0 }
 0x301   :  { %v314_v40 = vpop.permute.xlu1 %313 }
 0x302   :  { %v319_v41 = vsel %vm269_vm4, %v314_v40, 0 }
 0x303   :  { %1387 = vmatpush3.bf16.msra.mxu0 %v319_v41  ;;  %v599_v41 = vsel %vm269_vm4, %v589_v38, 0 }
 0x304   :  { %v1511_v42 = vpop.eup %1510  ;;  %1398 = vmatprep.subr.bf16.mxu0 %v1643_v0 }
 0x305   :  { %v252_v43 = vsel %vm140_vm2, %v1511_v42, 0.0  ;;  %v367_v46 = vpop.permute.xlu1 %366 }
 0x306   :  { %253 = vadd.xlane.f32.xlu0 %v252_v43  ;;  %v372_v53 = vsel %vm140_vm2, %v367_v46, 0  ;;  %v363_v43 = vld [vmem:[#allocation7] sm:$0xf] }
 0x307   :  { %v651_v46 = vsel %vm269_vm4, %v363_v43, 0 }
 0x308   :  { %v1513_v44 = vpop.eup %1512 }
 0x309   :  { %v255_v45 = vsel %vm140_vm2, %v1513_v44, 0.0 }
 0x30a   :  { %256 = vadd.xlane.f32.xlu1 %v255_v45 }
 0x31b   :  { %416 = vrot.lane.b32.xlu1 %v1740_v11, %s1646_s26 }
 0x31c   :  { %364 = vrot.lane.b32.xlu0 %v1737_v7, %s1647_s25 }
 0x31f   :  { %414 = vrot.lane.b32.xlu1 %v1740_v11, %s1647_s25 }
 0x393   :  { %v254_v47 = vpop.xlane.xlu0 %253 }
 0x394   :  { %1514 = vrcp.f32 %v254_v47 }
 0x397   :  { %v257_v48 = vpop.xlane.xlu1 %256  ;;  %v365_v58 = vpop.permute.xlu0 %364 }
 0x398   :  { %1516 = vrcp.f32 %v257_v48 }
 0x39b   :  { %v417_v55 = vpop.permute.xlu1 %416 }
 0x39c   :  { %v422_v57 = vsel %vm140_vm2, %v417_v55, 0 }
 0x39e   :  { %v1515_v49 = vpop.eup %1514 }
 0x39f   :  { %v260_v50 = vmul.f32 %v1515_v49, %v1511_v42  ;;  %v415_v59 = vpop.permute.xlu1 %414 }
 0x3a1   :  { %v262_v51 = vpack.c.bf16 %v260_v50, %v260_v50 }
 0x3a2   :  { %v1517_v52 = vpop.eup %1516 }
 0x3a3   :  { %v261_v54 = vmul.f32 %v1517_v52, %v1513_v44  ;;  %1383 = vmatmul.mubr.msk.bf16.vlgmr.msra.gmra.mrb[4].mxu1 %vm140_vm2, %v262_v51 }
 0x3a4   :  { %1393 = vmatpush3.bf16.xpose.msra.mxu1 %v372_v53  ;;  %1394 = vmatprep.mubr.msk.bf16.mxu1 %vm1644_vm0, %v1643_v0 }
 0x3a5   :  { %v263_v56 = vpack.c.bf16 %v261_v54, %v261_v54  ;;  %1404 = vmatprep.subr.bf16.mxu1 %v1643_v0 }
 0x3a7   :  { %1389 = vmatmul.mubr.msk.bf16.vlgmr.msra.gmra.mrb[8].mxu0 %vm140_vm2, %v263_v56 }
 0x3a8   :  { %1399 = vmatpush3.bf16.xpose.msra.mxu0 %v422_v57  ;;  %1400 = vmatprep.mubr.msk.bf16.mxu0 %vm1644_vm0, %v1643_v0 }
 0x3a9   :  { %1410 = vmatprep.subr.bf16.mxu0 %v1643_v0 }
 0x3ab   :  { %1395 = vmatmul.mubr.msk.bf16.vlgmr.msra.gmra.mrb[8].mxu1 %vm140_vm2, %v365_v58 }
 0x3ac   :  { %1406 = vmatprep.mubr.msk.bf16.mxu1 %vm1644_vm0, %v1643_v0 }
 0x3af   :  { %1401 = vmatmul.mubr.msk.bf16.vlgmr.msra.gmra.mrb[12].mxu0 %vm140_vm2, %v415_v59 }
 0x3b0   :  { %1412 = vmatprep.mubr.msk.bf16.mxu0 %vm1644_vm0, %v1643_v0 }
 0x476   :  { %v1795_v60 = vpop.f32.mrb[4].mxu1 }
 0x477   :  { %v1384_v61 = vpop.f32.mrb[5].mxu1 }
 0x478   :  { %v310_v62 = vpop.f32.mrb[6].mxu1 }
 0x479   :  { %v1385_v63 = vpop.f32.mrb[7].mxu1 }
 0x47a   :  { %v1797_v1 = vpop.f32.mrb[8].mxu0 }
 0x47b   :  { %v1314_v2 = vpack.c.bf16 %v1797_v1, %v1795_v60  ;;  %v1390_v3 = vpop.f32.mrb[9].mxu0 }
 0x47c   :  { %v358_v4 = vpop.f32.mrb[10].mxu0 }
 0x47d   :  { %v1391_v5 = vpop.f32.mrb[11].mxu0 }
 0x47e   :  { %v408_v6 = vpop.f32.mrb[8].mxu1 }
 0x47f   :  { %v464_v8 = vsel %vm1755_vm3, %v408_v6, -1e+30  ;;  %v1396_v9 = vpop.f32.mrb[9].mxu1 }
 0x480   :  { %v411_v10 = vpop.f32.mrb[10].mxu1  ;;  %v466_v12 = vsel %vm140_vm2, %v464_v8, -inf }
 0x481   :  { %467 = vmax.xlane.f32.xlu1 %v466_v12  ;;  %v1397_v13 = vpop.f32.mrb[11].mxu1 }
 0x482   :  { %v458_v14 = vpop.f32.mrb[12].mxu0 }
 0x483   :  { %v465_v15 = vsel %vm1755_vm3, %v458_v14, -1e+30  ;;  %v1402_v16 = vpop.f32.mrb[13].mxu0 }
 0x484   :  { %v461_v17 = vpop.f32.mrb[14].mxu0  ;;  %v469_v18 = vsel %vm140_vm2, %v465_v15, -inf }
 0x485   :  { %470 = vmax.xlane.f32.xlu0 %v469_v18  ;;  %v1403_v20 = vpop.f32.mrb[15].mxu0 }
 0x49b   :  { %538 = vrot.lane.b32.xlu0 %v1740_v11, %s1648_s29 }
 0x49f   :  { %694 = vrot.lane.b32.xlu0 %v1737_v7, %s1649_s30 }
 0x50e   :  { %v468_v21 = vpop.xlane.xlu1 %467 }
 0x50f   :  { %v472_v22 = vsub.f32 %v464_v8, %v468_v21 }
 0x511   :  { %v474_v23 = vmul.f32 1.442695, %v472_v22 }
 0x512   :  { %v471_v24 = vpop.xlane.xlu0 %470 }
 0x513   :  { %1518 = vpow2.f32 %v474_v23  ;;  %v473_v25 = vsub.f32 %v465_v15, %v471_v24 }
 0x515   :  { %v476_v26 = vmul.f32 1.442695, %v473_v25 }
 0x516   :  { %v539_v27 = vpop.permute.xlu0 %538 }
 0x517   :  { %1520 = vpow2.f32 %v476_v26  ;;  %v544_v28 = vsel %vm269_vm4, %v539_v27, 0 }
 0x518   :  { %1411 = vmatpush3.bf16.msra.mxu0 %v544_v28 }
 0x519   :  { %1422 = vmatprep.subr.bf16.mxu0 %v1643_v0 }
 0x51a   :  { %v695_v63 = vpop.permute.xlu0 %694 }
 0x51d   :  { %v1519_v29 = vpop.eup %1518 }
 0x51e   :  { %v478_v30 = vsel %vm140_vm2, %v1519_v29, 0.0 }
 0x51f   :  { %479 = vadd.xlane.f32.xlu1 %v478_v30 }
 0x521   :  { %v1521_v31 = vpop.eup %1520 }
 0x522   :  { %v481_v32 = vsel %vm140_vm2, %v1521_v31, 0.0 }
 0x523   :  { %482 = vadd.xlane.f32.xlu1 %v481_v32 }
 0x534   :  { %490 = vrot.lane.b32.xlu1 %v1737_v7, %s1648_s29 }
 0x538   :  { %696 = vrot.lane.b32.xlu1 %v1737_v7, %s1650_s5 }
 0x53c   :  { %746 = vrot.lane.b32.xlu1 %v1740_v11, %s1650_s5 }
 0x540   :  { %744 = vrot.lane.b32.xlu1 %v1740_v11, %s1649_s30 }
 0x5ac   :  { %v480_v33 = vpop.xlane.xlu1 %479 }
 0x5ad   :  { %1522 = vrcp.f32 %v480_v33 }
 0x5b0   :  { %v483_v34 = vpop.xlane.xlu1 %482 }
 0x5b1   :  { %1524 = vrcp.f32 %v483_v34 }
 0x5b4   :  { %v491_v35 = vpop.permute.xlu1 %490 }
 0x5b5   :  { %v496_v36 = vsel %vm269_vm4, %v491_v35, 0 }
 0x5b6   :  { %1405 = vmatpush3.bf16.msra.mxu1 %v496_v36 }
 0x5b7   :  { %v1523_v37 = vpop.eup %1522  ;;  %1416 = vmatprep.subr.bf16.mxu1 %v1643_v0 }
 0x5b8   :  { %v486_v39 = vmul.f32 %v1523_v37, %v1519_v29  ;;  %v697_v47 = vpop.permute.xlu1 %696 }
 0x5b9   :  { %v702_v59 = vsel %vm140_vm2, %v697_v47, 0 }
 0x5ba   :  { %v488_v40 = vpack.c.bf16 %v486_v39, %v486_v39 }
 0x5bb   :  { %v1525_v42 = vpop.eup %1524 }
 0x5bc   :  { %v487_v44 = vmul.f32 %v1525_v42, %v1521_v31  ;;  %1407 = vmatmul.mubr.msk.bf16.vlgmr.msra.gmra.mrb[12].mxu1 %vm140_vm2, %v488_v40  ;;  %v747_v48 = vpop.permute.xlu1 %746 }
 0x5bd   :  { %1417 = vmatpush3.bf16.msra.mxu1 %v599_v41  ;;  %1418 = vmatprep.mubr.msk.bf16.mxu1 %vm1644_vm0, %v1643_v0  ;;  %v752_v49 = vsel %vm140_vm2, %v747_v48, 0 }
 0x5be   :  { %v489_v45 = vpack.c.bf16 %v487_v44, %v487_v44  ;;  %1428 = vmatprep.subr.bf16.mxu1 %v1643_v0 }
 0x5c0   :  { %1413 = vmatmul.mubr.msk.bf16.vlgmr.msra.gmra.mrb[16].mxu0 %vm140_vm2, %v489_v45  ;;  %v745_v50 = vpop.permute.xlu1 %744 }
 0x5c1   :  { %1423 = vmatpush3.bf16.msra.mxu0 %v651_v46  ;;  %1424 = vmatprep.mubr.msk.bf16.mxu0 %vm1644_vm0, %v1643_v0 }
 0x5c2   :  { %1434 = vmatprep.subr.bf16.mxu0 %v1643_v0 }
 0x5c8   :  { %1425 = vmatmul.mubr.msk.bf16.vlgmr.msra.gmra.mrb[20].mxu0 %vm140_vm2, %v1314_v2 }
 0x5c9   :  { %1436 = vmatprep.mubr.msk.bf16.mxu0 %vm1644_vm0, %v1643_v0 }
 0x5ca   :  { %1435 = vmatpush3.bf16.xpose.msra.mxu0 %v752_v49  ;;  %v919_v49 = vld [vmem:[#allocation7 + $0x8] sm:$0xf] }
 0x5cb   :  { %1446 = vmatprep.subr.bf16.mxu0 %v1643_v0 }
 0x5d1   :  { %1437 = vmatmul.mubr.msk.bf16.vlgmr.msra.gmra.mrb[24].mxu0 %vm140_vm2, %v745_v50  ;;  %v929_v50 = vsel %vm269_vm4, %v919_v49, 0 }
 0x5d2   :  { %1448 = vmatprep.mubr.msk.bf16.mxu0 %vm1644_vm0, %v1643_v0 }
 0x68f   :  { %v532_v51 = vpop.f32.mrb[12].mxu1 }
 0x690   :  { %v1408_v52 = vpop.f32.mrb[13].mxu1 }
 0x691   :  { %v535_v53 = vpop.f32.mrb[14].mxu1 }
 0x692   :  { %v1409_v54 = vpop.f32.mrb[15].mxu1 }
 0x693   :  { %v580_v55 = vpop.f32.mrb[16].mxu0 }
 0x694   :  { %v1313_v56 = vpack.c.bf16 %v580_v55, %v532_v51  ;;  %v1414_v57 = vpop.f32.mrb[17].mxu0 }
 0x695   :  { %v583_v58 = vpop.f32.mrb[18].mxu0 }
 0x696   :  { %v1415_v60 = vpop.f32.mrb[19].mxu0  ;;  %1419 = vmatmul.mubr.msk.bf16.vlgmr.msra.gmra.mrb[16].mxu1 %vm140_vm2, %v1313_v56 }
 0x697   :  { %1429 = vmatpush3.bf16.xpose.msra.mxu1 %v702_v59  ;;  %1430 = vmatprep.mubr.msk.bf16.mxu1 %vm1644_vm0, %v1643_v0 }
 0x698   :  { %1440 = vmatprep.subr.bf16.mxu1 %v1643_v0 }
 0x69b   :  { %v687_v61 = vpop.f32.mrb[20].mxu0 }
 0x69c   :  { %v1426_v62 = vpop.f32.mrb[21].mxu0 }
 0x69d   :  { %v690_v1 = vpop.f32.mrb[22].mxu0 }
 0x69e   :  { %v1427_v2 = vpop.f32.mrb[23].mxu0  ;;  %1431 = vmatmul.mubr.msk.bf16.vlgmr.msra.gmra.mrb[20].mxu1 %vm140_vm2, %v695_v63 }
 0x69f   :  { %1442 = vmatprep.mubr.msk.bf16.mxu1 %vm1644_vm0, %v1643_v0 }
 0x6a4   :  { %v788_v3 = vpop.f32.mrb[24].mxu0 }
 0x6a5   :  { %v795_v4 = vsel %vm1755_vm3, %v788_v3, -1e+30  ;;  %v1438_v5 = vpop.f32.mrb[25].mxu0 }
 0x6a6   :  { %v791_v6 = vpop.f32.mrb[26].mxu0  ;;  %v799_v8 = vsel %vm140_vm2, %v795_v4, -inf }
 0x6a7   :  { %800 = vmax.xlane.f32.xlu1 %v799_v8  ;;  %v1439_v9 = vpop.f32.mrb[27].mxu0 }
 0x6b8   :  { %820 = vrot.lane.b32.xlu1 %v1737_v7, %s1651_s6 }
 0x6bc   :  { %976 = vrot.lane.b32.xlu1 %v1737_v7, %s1652_s7 }
 0x6c0   :  { %1026 = vrot.lane.b32.xlu1 %v1740_v11, %s1652_s7 }
 0x6c4   :  { %1024 = vrot.lane.b32.xlu1 %v1740_v11, %s1653_s8 }
 0x734   :  { %v801_v10 = vpop.xlane.xlu1 %800 }
 0x735   :  { %v803_v14 = vsub.f32 %v795_v4, %v801_v10 }
 0x737   :  { %v806_v15 = vmul.f32 1.442695, %v803_v14 }
 0x738   :  { %v821_v12 = vpop.permute.xlu1 %820 }
 0x739   :  { %v826_v13 = vsel %vm269_vm4, %v821_v12, 0  ;;  %1526 = vpow2.f32 %v806_v15 }
 0x73a   :  { %1441 = vmatpush3.bf16.msra.mxu1 %v826_v13 }
 0x73b   :  { %1452 = vmatprep.subr.bf16.mxu1 %v1643_v0 }
 0x73c   :  { %v977_v44 = vpop.permute.xlu1 %976 }
 0x73d   :  { %v982_v46 = vsel %vm140_vm2, %v977_v44, 0 }
 0x740   :  { %v1027_v55 = vpop.permute.xlu1 %1026 }
 0x741   :  { %v1032_v60 = vsel %vm140_vm2, %v1027_v55, 0 }
 0x743   :  { %v1527_v28 = vpop.eup %1526 }
 0x744   :  { %v811_v30 = vsel %vm140_vm2, %v1527_v28, 0.0  ;;  %v1025_v5 = vpop.permute.xlu1 %1024 }
 0x769   :  { %v635_v16 = vpop.f32.mrb[16].mxu1 }
 0x76a   :  { %v1859_v17 = vadd.f32 %v687_v61, %v635_v16  ;;  %v1420_v18 = vpop.f32.mrb[17].mxu1 }
 0x76b   :  { %v638_v20 = vpop.f32.mrb[18].mxu1 }
 0x76c   :  { %v1861_v21 = vadd.f32 %v690_v1, %v638_v20  ;;  %v1421_v22 = vpop.f32.mrb[19].mxu1 }
 0x771   :  { %v738_v23 = vpop.f32.mrb[20].mxu1 }
 0x772   :  { %v794_v24 = vsel %vm1755_vm3, %v738_v23, -1e+30  ;;  %v1432_v25 = vpop.f32.mrb[21].mxu1 }
 0x773   :  { %v741_v26 = vpop.f32.mrb[22].mxu1  ;;  %v796_v27 = vsel %vm140_vm2, %v794_v24, -inf }
 0x774   :  { %797 = vmax.xlane.f32.xlu0 %v796_v27  ;;  %v1433_v29 = vpop.f32.mrb[23].mxu1 }
 0x778   :  { %812 = vadd.xlane.f32.xlu0 %v811_v30 }
 0x801   :  { %v798_v31 = vpop.xlane.xlu0 %797 }
 0x802   :  { %v802_v32 = vsub.f32 %v794_v24, %v798_v31 }
 0x804   :  { %v804_v33 = vmul.f32 1.442695, %v802_v32 }
 0x805   :  { %v813_v36 = vpop.xlane.xlu0 %812 }
 0x806   :  { %1528 = vpow2.f32 %v804_v33 }
 0x807   :  { %1530 = vrcp.f32 %v813_v36 }
 0x810   :  { %v1529_v34 = vpop.eup %1528 }
 0x811   :  { %v808_v35 = vsel %vm140_vm2, %v1529_v34, 0.0  ;;  %v1531_v37 = vpop.eup %1530 }
 0x812   :  { %809 = vadd.xlane.f32.xlu0 %v808_v35  ;;  %v817_v39 = vmul.f32 %v1531_v37, %v1527_v28  ;;  %v1199_v35 = vld [vmem:[#allocation7 + $0xc] sm:$0xf] }
 0x813   :  { %v1209_v36 = vsel %vm269_vm4, %v1199_v35, 0 }
 0x814   :  { %v819_v42 = vpack.c.bf16 %v817_v39, %v817_v39 }
 0x828   :  { %868 = vrot.lane.b32.xlu0 %v1740_v11, %s1651_s6 }
 0x82c   :  { %974 = vrot.lane.b32.xlu0 %v1737_v7, %s1653_s8 }
 0x89f   :  { %v810_v38 = vpop.xlane.xlu0 %809 }
 0x8a0   :  { %1532 = vrcp.f32 %v810_v38 }
 0x8a3   :  { %v869_v40 = vpop.permute.xlu0 %868 }
 0x8a4   :  { %v874_v41 = vsel %vm269_vm4, %v869_v40, 0 }
 0x8a5   :  { %1447 = vmatpush3.bf16.msra.mxu0 %v874_v41 }
 0x8a6   :  { %1458 = vmatprep.subr.bf16.mxu0 %v1643_v0 }
 0x8a7   :  { %v975_v48 = vpop.permute.xlu0 %974 }
 0x8a8   :  { %1449 = vmatmul.mubr.msk.bf16.vlgmr.msra.gmra.mrb[28].mxu0 %vm140_vm2, %v819_v42 }
 0x8a9   :  { %1460 = vmatprep.mubr.msk.bf16.mxu0 %vm1644_vm0, %v1643_v0 }
 0x8aa   :  { %v1533_v43 = vpop.eup %1532 }
 0x8ab   :  { %v816_v45 = vmul.f32 %v1533_v43, %v1529_v34 }
 0x8ad   :  { %v818_v47 = vpack.c.bf16 %v816_v45, %v816_v45 }
 0x8ae   :  { %1459 = vmatpush3.bf16.xpose.msra.mxu0 %v982_v46 }
 0x8af   :  { %1443 = vmatmul.mubr.msk.bf16.vlgmr.msra.gmra.mrb[24].mxu1 %vm140_vm2, %v818_v47  ;;  %1470 = vmatprep.subr.bf16.mxu0 %v1643_v0 }
 0x8b0   :  { %1454 = vmatprep.mubr.msk.bf16.mxu1 %vm1644_vm0, %v1643_v0  ;;  %1453 = vmatpush3.bf16.msra.mxu1 %v929_v50 }
 0x8b1   :  { %1464 = vmatprep.subr.bf16.mxu1 %v1643_v0 }
 0x8b5   :  { %1461 = vmatmul.mubr.msk.bf16.vlgmr.msra.gmra.mrb[32].mxu0 %vm140_vm2, %v975_v48 }
 0x8b6   :  { %1472 = vmatprep.mubr.msk.bf16.mxu0 %vm1644_vm0, %v1643_v0 }
 0x97b   :  { %v910_v51 = vpop.f32.mrb[28].mxu0 }
 0x97c   :  { %v1450_v52 = vpop.f32.mrb[29].mxu0 }
 0x97d   :  { %v913_v53 = vpop.f32.mrb[30].mxu0 }
 0x97e   :  { %v1451_v54 = vpop.f32.mrb[31].mxu0 }
 0x982   :  { %v862_v56 = vpop.f32.mrb[24].mxu1 }
 0x983   :  { %v1315_v57 = vpack.c.bf16 %v910_v51, %v862_v56  ;;  %v1444_v58 = vpop.f32.mrb[25].mxu1  ;;  %v1311_v51 = vld [vmem:[%s1939_s3] ss:$0 sm:$0xff] }
 0x984   :  { %v865_v59 = vpop.f32.mrb[26].mxu1 }
 0x985   :  { %v1445_v61 = vpop.f32.mrb[27].mxu1  ;;  %1455 = vmatmul.mubr.msk.bf16.vlgmr.msra.gmra.mrb[28].mxu1 %vm140_vm2, %v1315_v57 }
 0x986   :  { %1465 = vmatpush3.bf16.xpose.msra.mxu1 %v1032_v60  ;;  %1466 = vmatprep.mubr.msk.bf16.mxu1 %vm1644_vm0, %v1643_v0 }
 0x987   :  { %1476 = vmatprep.subr.bf16.mxu1 %v1643_v0 }
 0x988   :  { %v1018_v62 = vpop.f32.mrb[32].mxu0 }
 0x989   :  { %v1074_v63 = vsel %vm1755_vm3, %v1018_v62, -1e+30  ;;  %v1462_v1 = vpop.f32.mrb[33].mxu0 }
 0x98a   :  { %v1021_v2 = vpop.f32.mrb[34].mxu0  ;;  %v1076_v3 = vsel %vm140_vm2, %v1074_v63, -inf }
 0x98b   :  { %1077 = vmax.xlane.f32.xlu0 %v1076_v3  ;;  %v1463_v4 = vpop.f32.mrb[35].mxu0 }
 0x98d   :  { %1467 = vmatmul.mubr.msk.bf16.vlgmr.msra.gmra.mrb[32].mxu1 %vm140_vm2, %v1025_v5 }
 0x98e   :  { %1478 = vmatprep.mubr.msk.bf16.mxu1 %vm1644_vm0, %v1643_v0 }
 0xa18   :  { %v1078_v6 = vpop.xlane.xlu0 %1077 }
 0xa19   :  { %v1082_v8 = vsub.f32 %v1074_v63, %v1078_v6 }
 0xa1b   :  { %v1084_v9 = vmul.f32 1.442695, %v1082_v8 }
 0xa1d   :  { %1534 = vpow2.f32 %v1084_v9 }
 0xa27   :  { %v1535_v10 = vpop.eup %1534 }
 0xa28   :  { %v1088_v12 = vsel %vm140_vm2, %v1535_v10, 0.0 }
 0xa29   :  { %1089 = vadd.xlane.f32.xlu0 %v1088_v12 }
 0xa58   :  { %v965_v13 = vpop.f32.mrb[28].mxu1 }
 0xa59   :  { %v972_v14 = vadd.f32 %v965_v13, %v1859_v17  ;;  %v1456_v15 = vpop.f32.mrb[29].mxu1 }
 0xa5a   :  { %v968_v16 = vpop.f32.mrb[30].mxu1 }
 0xa5b   :  { %v973_v18 = vadd.f32 %v968_v16, %v1861_v21  ;;  %v1457_v20 = vpop.f32.mrb[31].mxu1 }
 0xa60   :  { %v1068_v22 = vpop.f32.mrb[32].mxu1 }
 0xa61   :  { %v1075_v23 = vsel %vm1755_vm3, %v1068_v22, -1e+30  ;;  %v1468_v24 = vpop.f32.mrb[33].mxu1 }
 0xa62   :  { %v1071_v25 = vpop.f32.mrb[34].mxu1  ;;  %v1079_v26 = vsel %vm140_vm2, %v1075_v23, -inf }
 0xa63   :  { %1080 = vmax.xlane.f32.xlu1 %v1079_v26  ;;  %v1469_v27 = vpop.f32.mrb[35].mxu1 }
 0xa74   :  { %1100 = vrot.lane.b32.xlu1 %v1737_v7, %s1654_s9 }
 0xab6   :  { %v1090_v28 = vpop.xlane.xlu0 %1089 }
 0xab7   :  { %1536 = vrcp.f32 %v1090_v28 }
 0xac1   :  { %v1537_v17 = vpop.eup %1536 }
 0xac2   :  { %v1096_v21 = vmul.f32 %v1537_v17, %v1535_v10 }
 0xac4   :  { %v1098_v33 = vpack.c.bf16 %v1096_v21, %v1096_v21 }
 0xaf0   :  { %v1081_v29 = vpop.xlane.xlu1 %1080 }
 0xaf1   :  { %v1083_v30 = vsub.f32 %v1075_v23, %v1081_v29 }
 0xaf3   :  { %v1086_v31 = vmul.f32 1.442695, %v1083_v30 }
 0xaf4   :  { %v1101_v32 = vpop.permute.xlu1 %1100 }
 0xaf5   :  { %1538 = vpow2.f32 %v1086_v31  ;;  %v1106_v19 = vsel %vm269_vm4, %v1101_v32, 0 }
 0xaf6   :  { %1471 = vmatpush3.bf16.msra.mxu0 %v1106_v19 }
 0xaf7   :  { %1482 = vmatprep.subr.bf16.mxu0 %v1643_v0 }
 0xaf9   :  { %1473 = vmatmul.mubr.msk.bf16.vlgmr.msra.gmra.mrb[36].mxu0 %vm140_vm2, %v1098_v33 }
 0xafa   :  { %1484 = vmatprep.mubr.msk.bf16.mxu0 %vm1644_vm0, %v1643_v0  ;;  %1483 = vmatpush3.bf16.msra.mxu0 %v1209_v36 }
 0xaff   :  { %v1539_v7 = vpop.eup %1538 }
 0xb00   :  { %v1091_v34 = vsel %vm140_vm2, %v1539_v7, 0.0 }
 0xb01   :  { %1092 = vadd.xlane.f32.xlu0 %v1091_v34 }
 0xb17   :  { %1148 = vrot.lane.b32.xlu0 %v1740_v11, %s1654_s9 }
 0xb8e   :  { %v1093_v37 = vpop.xlane.xlu0 %1092 }
 0xb8f   :  { %1540 = vrcp.f32 %v1093_v37 }
 0xb92   :  { %v1149_v38 = vpop.permute.xlu0 %1148 }
 0xb93   :  { %v1154_v39 = vsel %vm269_vm4, %v1149_v38, 0 }
 0xb94   :  { %1477 = vmatpush3.bf16.msra.mxu1 %v1154_v39 }
 0xb99   :  { %v1541_v40 = vpop.eup %1540 }
 0xb9a   :  { %v1097_v41 = vmul.f32 %v1541_v40, %v1539_v7 }
 0xb9c   :  { %v1099_v42 = vpack.c.bf16 %v1097_v41, %v1097_v41 }
 0xb9e   :  { %1479 = vmatmul.mubr.msk.bf16.vlgmr.msra.gmra.mrb[36].mxu1 %vm140_vm2, %v1099_v42 }
 0xbcc   :  { %v1142_v0 = vpop.f32.mrb[36].mxu0 }
 0xbcd   :  { %v1474_v43 = vpop.f32.mrb[37].mxu0 }
 0xbce   :  { %v1145_v44 = vpop.f32.mrb[38].mxu0 }
 0xbcf   :  { %v1475_v45 = vpop.f32.mrb[39].mxu0 }
 0xc71   :  { %v1190_v11 = vpop.f32.mrb[36].mxu1 }
 0xc72   :  { %v1316_v46 = vpack.c.bf16 %v1190_v11, %v1142_v0  ;;  %v1480_v47 = vpop.f32.mrb[37].mxu1 }
 0xc73   :  { %v1193_v48 = vpop.f32.mrb[38].mxu1 }
 0xc74   :  { %v1481_v49 = vpop.f32.mrb[39].mxu1  ;;  %1485 = vmatmul.mubr.msk.bf16.vlgmr.msra.gmra.mrb[40].mxu0 %vm140_vm2, %v1316_v46 }
 0xd47   :  { %v1245_v50 = vpop.f32.mrb[40].mxu0 }
 0xd48   :  { %v1252_v52 = vadd.f32 %v1245_v50, %v972_v14  ;;  %v1486_v53 = vpop.f32.mrb[41].mxu0 }
 0xd49   :  { %v1248_v54 = vpop.f32.mrb[42].mxu0 }
 0xd4a   :  { %v1261_v55 = vadd.f32 %v1311_v51, %v1252_v52  ;;  %v1253_v56 = vadd.f32 %v1248_v54, %v973_v18  ;;  %v1487_v57 = vpop.f32.mrb[43].mxu0 }
 0xd4c   :  { %1263 = vst.msk [vmem:[#allocation8] sm:$0xff] %vm85_vm1, %v1261_v55  ;;  %v1262_v58 = vadd.f32 %v1311_v51, %v1253_v56 }
 0xd4e   :  { %1264 = vst.msk [vmem:[#allocation8 + $0x8] sm:$0xff] %vm85_vm1, %v1262_v58 }
 0xd4f   :  { %1619 = shalt.err (!%p1616_p0)
}
 0xd50   :  { %s1620_s17 = scalar_lea.hbm %s1940_s4, 256 }
 0xd51   :  { %p1621_p1 = scmp.ne.s32.totalorder %s1940_s4, %s1620_s17  ;;  %p1624_p2 = scmp.lt.u32.totalorder %s1620_s17, %s1940_s4 }
 0xd53   :  { %p1626_p3 = pnand %p1624_p2, %p1621_p1 }
 0xd55   :  { %1629 = shalt.err (!%p1626_p3)
}
 0xd56   :  { %1276 = dma.vmem_to_hbm [thread:$0]  %s1271_s14, 256, %s1940_s4, [#allocation4], %s1640_s1, %s1640_s1, %s1641_s13  }
 0xd57   :  { %1634 = dma.done.wait [#allocation4], 256  }
 0xd58   :  { %1635 = vsyncadd [#allocation4], 4294967040 }
 0xd59   :  { %1280 = vsyncpa [#allocation3], 1 }
 0xd5a   :  { %1281 = vsyncpa [#allocation6], 1 }
 0xd5b   :  { %1282 = vsyncpa [#allocation4], 1 }

</bundles_post_ra>
